<compile_context>
chip_gen: v7x
topology: tpu7x:2x2x1
jax: 0.10.0
libtpu: 0.0.40
codegen_flags: <defaults>
</compile_context>

<pallas_src>
import functools

import jax
import jax.numpy as jnp
import numpy as np
from jax.experimental import pallas as pl
from jax.experimental.pallas import tpu as pltpu


def _round_up(x, m):
    return ((x + m - 1) // m) * m


def _temporal_emb_kernel(idx_ref, table_ref, bias_ref, o_ref, *, G):
    # idx_ref   : (Rt, G*n_idx) int32  band-relative indices (negative sentinel => no hit)
    # table_ref : (G*Kpad, G*d) f32    G-way block-diagonal conv-folded embedding table
    # bias_ref  : (1, G*d)      f32    conv bias, tiled G times
    # o_ref     : (Rt, G*d)            output block (lane-dense last dim)
    Rt = idx_ref.shape[0]
    Kpad = table_ref.shape[0] // G
    n_idx = idx_ref.shape[1] // G          # 2 * t_patch_size (static)

    # One (Rt, Kpad) iota, hoisted and reused by every band.
    iota_k = jax.lax.broadcasted_iota(jnp.int32, (Rt, Kpad), 1)

    # Band-by-band multi-hot build: member g of a wide row only hits band g, so each band costs
    # n_idx width-Kpad compares (VPU cost per original row is independent of G).
    bands = []
    for g in range(G):                     # static, tiny unrolled loops (G * n_idx compares)
        base = g * n_idx
        hot_g = idx_ref[:, base:base + 1] == iota_k
        for j in range(1, n_idx):
            hot_g = jnp.logical_or(hot_g, idx_ref[:, base + j:base + j + 1] == iota_k)
        bands.append(hot_g.astype(table_ref.dtype))
    hot = bands[0] if G == 1 else jnp.concatenate(bands, axis=1)   # (Rt, G*Kpad), 128-lane aligned

    # Single MXU matmul per block; f32 inputs, f32 accumulate (MXU is nowhere near the bottleneck).
    acc = jnp.dot(hot, table_ref[...], preferred_element_type=jnp.float32)
    o_ref[...] = (acc + bias_ref[...]).astype(o_ref.dtype)


@functools.partial(jax.jit, static_argnames=("t_patch_size", "row_tile", "out_dtype"))
def temporal_embedding(x, hour_table, weekday_table, conv_w, conv_b,
                       t_patch_size, row_tile=2048, out_dtype=jnp.float32):
    """Pallas TemporalEmbedding forward.

    x: (B, T, 2) integer features with x[..., 0] = weekday, x[..., 1] = hour.
    Returns (B, T // t_patch_size, d_model) in `out_dtype` (default float32, like the module).
    """
    B, T, _ = x.shape
    H, d = hour_table.shape
    Wd = weekday_table.shape[0]
    tp = int(t_patch_size)
    assert T % tp == 0
    Pn = T // tp
    R = B * Pn                             # total output rows (flattened batch x patches)
    seg = H + Wd
    Ktot = tp * seg

    # --- Fold conv weights into the embedding tables (tiny one-time XLA op, f32) -----------
    # conv_w is (out_c, in_c, k) like PyTorch; fused[k*seg+s, o] = sum_c cat[s,c] * conv_w[o,c,k].
    cat = jnp.concatenate([hour_table, weekday_table], axis=0).astype(jnp.float32)   # (seg, d)
    w_taps = jnp.transpose(conv_w.astype(jnp.float32), (2, 1, 0))                    # (tp, c, o)
    fused = jnp.einsum('sc,kco->kso', cat, w_taps).reshape(Ktot, d)                  # (tp*seg, d)
    Kpad = _round_up(Ktot, 128)            # lane-align contraction dim; keep at 128-multiple
    fused = jnp.pad(fused, ((0, Kpad - Ktot), (0, 0)))

    # --- Row grouping so the stored output last dim is lane-dense (>= 128 when possible) ---
    G = max(1, 128 // d)
    while G > 1 and R % G:                 # keep G dividing R so no output padding/slice is needed
        G -= 1
    Rg = R // G

    if G > 1:
        eye_g = jnp.eye(G, dtype=fused.dtype)
        table = jnp.einsum('kd,gh->gkhd', fused, eye_g).reshape(G * Kpad, G * d)   # block-diagonal
    else:
        table = fused
    bias_w = jnp.tile(conv_b.astype(jnp.float32), (G,)).reshape(1, G * d)

    # --- Band-relative pre-offset indices: member g occupies columns [g*2tp, (g+1)*2tp) -----
    hour_idx = x[:, :, 1].astype(jnp.int32).reshape(R, tp)
    wday_idx = x[:, :, 0].astype(jnp.int32).reshape(R, tp)
    tap_off = (jnp.arange(tp, dtype=jnp.int32) * seg)[None, :]
    idx = jnp.concatenate([hour_idx + tap_off, wday_idx + tap_off + H], axis=1)     # (R, 2*tp)
    idx = idx.reshape(Rg, G * 2 * tp)

    # --- Wide-row tiling: big tiles (default 2048 original rows) amortize per-step cost -----
    rt_g = max(1, int(row_tile) // G)
    if rt_g >= Rg:
        rt_g = Rg                          # single block; block dim == full dim satisfies tiling
        nb = 1
    else:
        rt_g = _round_up(rt_g, 16)         # 16-row multiple keeps sublane packing clean
        nb = -(-Rg // rt_g)
        pad_rows = nb * rt_g - Rg
        if pad_rows:
            # Only the (small, int32) index array is padded. Output keeps its exact (Rg, G*d)
            # shape: Pallas masks the partial tail block on writeback, so the sentinel rows are
            # never stored and no out[:R] slice (extra HBM pass) is needed.
            idx = jnp.pad(idx, ((0, pad_rows), (0, 0)), constant_values=-1)

    out = pl.pallas_call(
        functools.partial(_temporal_emb_kernel, G=G),
        out_shape=jax.ShapeDtypeStruct((Rg, G * d), out_dtype),
        grid_spec=pltpu.PrefetchScalarGridSpec(
            num_scalar_prefetch=0,
            grid=(nb,),
            in_specs=[
                pl.BlockSpec((rt_g, G * 2 * tp), lambda i: (i, 0)),   # indices, tiled over rows
                pl.BlockSpec((G * Kpad, G * d), lambda i: (0, 0)),    # fused table, resident
                pl.BlockSpec((1, G * d), lambda i: (0, 0)),           # bias, resident
            ],
            out_specs=pl.BlockSpec((rt_g, G * d), lambda i: (i, 0)),
        ),
        compiler_params=pltpu.CompilerParams(
            dimension_semantics=("parallel",),        # shards row blocks across TCs on v7x
            vmem_limit_bytes=32 * 1024 * 1024,        # safe on v5e/v6e/v7x at these block sizes
        ),
    )(idx, table, bias_w)

    # (Rg, G*d) -> (B, Pn, d): contiguous reshape, no data movement.
    return out.reshape(B, Pn, d)


def temporal_embedding_reference(x, hour_table, weekday_table, conv_w, conv_b, tp):
    """Pure-JAX reference matching the PyTorch module exactly (f32)."""
    hour_x = hour_table[x[:, :, 1]]        # (B, T, d)
    wday_x = weekday_table[x[:, :, 0]]     # (B, T, d)
    s = hour_x + wday_x
    B, T, d = s.shape
    Pn = T // tp
    s_p = s.reshape(B, Pn, tp, d)
    # Conv1d(k=tp, stride=tp), NCL: out[b,p,o] = b[o] + sum_{k,c} W[o,c,k] * s[b, p*tp+k, c]
    return jnp.einsum('bpkc,ock->bpo', s_p, conv_w) + conv_b


if __name__ == "__main__":
    # small shapes consistent with the module
    B, T = 2, 8
    d_model = 32
    t_patch_size = 2
    hour_size = 48
    weekday_size = 7

    key = jax.random.PRNGKey(0)
    k_hr, k_wd, k_w, k_b, k_xh, k_xw = jax.random.split(key, 6)

    # deterministic synthetic parameters (shapes as in the PyTorch __init__)
    hour_table = jax.random.normal(k_hr, (hour_size, d_model), jnp.float32) * 0.02
    weekday_table = jax.random.normal(k_wd, (weekday_size, d_model), jnp.float32) * 0.02
    conv_w = jax.random.normal(k_w, (d_model, d_model, t_patch_size), jnp.float32) * 0.1
    conv_b = jax.random.normal(k_b, (d_model,), jnp.float32) * 0.1

    # input x: (B, T, 2) integer time features (weekday, hour)
    wday = jax.random.randint(k_xw, (B, T, 1), 0, weekday_size, jnp.int32)
    hour = jax.random.randint(k_xh, (B, T, 1), 0, hour_size, jnp.int32)
    x = jnp.concatenate([wday, hour], axis=-1)

    out = temporal_embedding(x, hour_table, weekday_table, conv_w, conv_b, t_patch_size)
    out = jax.block_until_ready(out)

    ref = temporal_embedding_reference(x, hour_table, weekday_table, conv_w, conv_b,
                                       t_patch_size)
    assert out.shape == (B, T // t_patch_size, d_model)
    # Full f32 path (table + one-hot + MXU accumulate): only association-order rounding remains.
    assert np.allclose(np.asarray(out), np.asarray(ref), atol=1e-4, rtol=1e-4)

    # TODO(synk): like the one-hot formulation, out-of-range indices yield a zero embedding
    # row instead of raising as PyTorch nn.Embedding would.
    print("KERNEL_OK")
</pallas_src>

<mosaic_0001>
module attributes {stable_mosaic.version = 11 : i64} {
  func.func @_temporal_emb_kernel(%arg0: i32, %arg1: memref<2x16xi32, #tpu.memory_space<vmem>>, %arg2: memref<512x128xf32, #tpu.memory_space<vmem>>, %arg3: memref<1x128xf32, #tpu.memory_space<vmem>>, %arg4: memref<2x128xf32, #tpu.memory_space<vmem>>) attributes {dimension_semantics = [#tpu.dimension_semantics<parallel>], iteration_bounds = array<i64: 1>, scalar_prefetch = 0 : i64, scratch_operands = 0 : i64, tpu.core_type = #tpu.core_type<tc>, window_params = [{transform_indices = @transform_0, window_bounds = array<i64: 2, 16>}, {pipeline_mode = #tpu.pipeline_mode<synchronous>, transform_indices = @transform_1, window_bounds = array<i64: 512, 128>}, {pipeline_mode = #tpu.pipeline_mode<synchronous>, transform_indices = @transform_2, window_bounds = array<i64: 1, 128>}, {transform_indices = @transform_3, window_bounds = array<i64: 2, 128>}]} {
    %0 = tpu.iota {dimensions = array<i32: 1>} : vector<2x128xi32>
    %c0 = arith.constant 0 : index
    %c0_0 = arith.constant 0 : index
    %1 = vector.load %arg1[%c0, %c0_0] : memref<2x16xi32, #tpu.memory_space<vmem>>, vector<2x1xi32>
    %2 = vector.broadcast %1 : vector<2x1xi32> to vector<2x128xi32>
    %3 = arith.cmpi eq, %2, %0 : vector<2x128xi32>
    %c0_1 = arith.constant 0 : index
    %c1 = arith.constant 1 : index
    %4 = vector.load %arg1[%c0_1, %c1] : memref<2x16xi32, #tpu.memory_space<vmem>>, vector<2x1xi32>
    %5 = vector.broadcast %4 : vector<2x1xi32> to vector<2x128xi32>
    %6 = arith.cmpi eq, %5, %0 : vector<2x128xi32>
    %7 = arith.ori %3, %6 : vector<2x128xi1>
    %c0_2 = arith.constant 0 : index
    %c2 = arith.constant 2 : index
    %8 = vector.load %arg1[%c0_2, %c2] : memref<2x16xi32, #tpu.memory_space<vmem>>, vector<2x1xi32>
    %9 = vector.broadcast %8 : vector<2x1xi32> to vector<2x128xi32>
    %10 = arith.cmpi eq, %9, %0 : vector<2x128xi32>
    %11 = arith.ori %7, %10 : vector<2x128xi1>
    %c0_3 = arith.constant 0 : index
    %c3 = arith.constant 3 : index
    %12 = vector.load %arg1[%c0_3, %c3] : memref<2x16xi32, #tpu.memory_space<vmem>>, vector<2x1xi32>
    %13 = vector.broadcast %12 : vector<2x1xi32> to vector<2x128xi32>
    %14 = arith.cmpi eq, %13, %0 : vector<2x128xi32>
    %15 = arith.ori %11, %14 : vector<2x128xi1>
    %16 = arith.extui %15 : vector<2x128xi1> to vector<2x128xi32>
    %17 = arith.sitofp %16 : vector<2x128xi32> to vector<2x128xf32>
    %c0_4 = arith.constant 0 : index
    %c4 = arith.constant 4 : index
    %18 = vector.load %arg1[%c0_4, %c4] : memref<2x16xi32, #tpu.memory_space<vmem>>, vector<2x1xi32>
    %19 = vector.broadcast %18 : vector<2x1xi32> to vector<2x128xi32>
    %20 = arith.cmpi eq, %19, %0 : vector<2x128xi32>
    %c0_5 = arith.constant 0 : index
    %c5 = arith.constant 5 : index
    %21 = vector.load %arg1[%c0_5, %c5] : memref<2x16xi32, #tpu.memory_space<vmem>>, vector<2x1xi32>
    %22 = vector.broadcast %21 : vector<2x1xi32> to vector<2x128xi32>
    %23 = arith.cmpi eq, %22, %0 : vector<2x128xi32>
    %24 = arith.ori %20, %23 : vector<2x128xi1>
    %c0_6 = arith.constant 0 : index
    %c6 = arith.constant 6 : index
    %25 = vector.load %arg1[%c0_6, %c6] : memref<2x16xi32, #tpu.memory_space<vmem>>, vector<2x1xi32>
    %26 = vector.broadcast %25 : vector<2x1xi32> to vector<2x128xi32>
    %27 = arith.cmpi eq, %26, %0 : vector<2x128xi32>
    %28 = arith.ori %24, %27 : vector<2x128xi1>
    %c0_7 = arith.constant 0 : index
    %c7 = arith.constant 7 : index
    %29 = vector.load %arg1[%c0_7, %c7] : memref<2x16xi32, #tpu.memory_space<vmem>>, vector<2x1xi32>
    %30 = vector.broadcast %29 : vector<2x1xi32> to vector<2x128xi32>
    %31 = arith.cmpi eq, %30, %0 : vector<2x128xi32>
    %32 = arith.ori %28, %31 : vector<2x128xi1>
    %33 = arith.extui %32 : vector<2x128xi1> to vector<2x128xi32>
    %34 = arith.sitofp %33 : vector<2x128xi32> to vector<2x128xf32>
    %c0_8 = arith.constant 0 : index
    %c8 = arith.constant 8 : index
    %35 = vector.load %arg1[%c0_8, %c8] : memref<2x16xi32, #tpu.memory_space<vmem>>, vector<2x1xi32>
    %36 = vector.broadcast %35 : vector<2x1xi32> to vector<2x128xi32>
    %37 = arith.cmpi eq, %36, %0 : vector<2x128xi32>
    %c0_9 = arith.constant 0 : index
    %c9 = arith.constant 9 : index
    %38 = vector.load %arg1[%c0_9, %c9] : memref<2x16xi32, #tpu.memory_space<vmem>>, vector<2x1xi32>
    %39 = vector.broadcast %38 : vector<2x1xi32> to vector<2x128xi32>
    %40 = arith.cmpi eq, %39, %0 : vector<2x128xi32>
    %41 = arith.ori %37, %40 : vector<2x128xi1>
    %c0_10 = arith.constant 0 : index
    %c10 = arith.constant 10 : index
    %42 = vector.load %arg1[%c0_10, %c10] : memref<2x16xi32, #tpu.memory_space<vmem>>, vector<2x1xi32>
    %43 = vector.broadcast %42 : vector<2x1xi32> to vector<2x128xi32>
    %44 = arith.cmpi eq, %43, %0 : vector<2x128xi32>
    %45 = arith.ori %41, %44 : vector<2x128xi1>
    %c0_11 = arith.constant 0 : index
    %c11 = arith.constant 11 : index
    %46 = vector.load %arg1[%c0_11, %c11] : memref<2x16xi32, #tpu.memory_space<vmem>>, vector<2x1xi32>
    %47 = vector.broadcast %46 : vector<2x1xi32> to vector<2x128xi32>
    %48 = arith.cmpi eq, %47, %0 : vector<2x128xi32>
    %49 = arith.ori %45, %48 : vector<2x128xi1>
    %50 = arith.extui %49 : vector<2x128xi1> to vector<2x128xi32>
    %51 = arith.sitofp %50 : vector<2x128xi32> to vector<2x128xf32>
    %c0_12 = arith.constant 0 : index
    %c12 = arith.constant 12 : index
    %52 = vector.load %arg1[%c0_12, %c12] : memref<2x16xi32, #tpu.memory_space<vmem>>, vector<2x1xi32>
    %53 = vector.broadcast %52 : vector<2x1xi32> to vector<2x128xi32>
    %54 = arith.cmpi eq, %53, %0 : vector<2x128xi32>
    %c0_13 = arith.constant 0 : index
    %c13 = arith.constant 13 : index
    %55 = vector.load %arg1[%c0_13, %c13] : memref<2x16xi32, #tpu.memory_space<vmem>>, vector<2x1xi32>
    %56 = vector.broadcast %55 : vector<2x1xi32> to vector<2x128xi32>
    %57 = arith.cmpi eq, %56, %0 : vector<2x128xi32>
    %58 = arith.ori %54, %57 : vector<2x128xi1>
    %c0_14 = arith.constant 0 : index
    %c14 = arith.constant 14 : index
    %59 = vector.load %arg1[%c0_14, %c14] : memref<2x16xi32, #tpu.memory_space<vmem>>, vector<2x1xi32>
    %60 = vector.broadcast %59 : vector<2x1xi32> to vector<2x128xi32>
    %61 = arith.cmpi eq, %60, %0 : vector<2x128xi32>
    %62 = arith.ori %58, %61 : vector<2x128xi1>
    %c0_15 = arith.constant 0 : index
    %c15 = arith.constant 15 : index
    %63 = vector.load %arg1[%c0_15, %c15] : memref<2x16xi32, #tpu.memory_space<vmem>>, vector<2x1xi32>
    %64 = vector.broadcast %63 : vector<2x1xi32> to vector<2x128xi32>
    %65 = arith.cmpi eq, %64, %0 : vector<2x128xi32>
    %66 = arith.ori %62, %65 : vector<2x128xi1>
    %67 = arith.extui %66 : vector<2x128xi1> to vector<2x128xi32>
    %68 = arith.sitofp %67 : vector<2x128xi32> to vector<2x128xf32>
    %69 = tpu.concatenate %17, %34, %51, %68 in 1 : vector<2x128xf32>, vector<2x128xf32>, vector<2x128xf32>, vector<2x128xf32> -> vector<2x512xf32>
    %c0_16 = arith.constant 0 : index
    %c0_17 = arith.constant 0 : index
    %70 = vector.load %arg2[%c0_16, %c0_17] : memref<512x128xf32, #tpu.memory_space<vmem>>, vector<512x128xf32>
    %cst = arith.constant dense<0.000000e+00> : vector<2x128xf32>
    %71 = tpu.matmul %69, %70, %cst {dimension_numbers = #tpu.dot_dimension_numbers<[1], [0], [0], [1], [0, 0, 1, 1], [], []>} : vector<2x512xf32>, vector<512x128xf32>, vector<2x128xf32> -> vector<2x128xf32>
    %c0_18 = arith.constant 0 : index
    %c0_19 = arith.constant 0 : index
    %72 = vector.load %arg3[%c0_18, %c0_19] : memref<1x128xf32, #tpu.memory_space<vmem>>, vector<1x128xf32>
    %73 = vector.broadcast %72 : vector<1x128xf32> to vector<2x128xf32>
    %74 = arith.addf %71, %73 : vector<2x128xf32>
    %c0_20 = arith.constant 0 : index
    %c0_21 = arith.constant 0 : index
    %75 = vector.load %arg4[%c0_20, %c0_21] : memref<2x128xf32, #tpu.memory_space<vmem>>, vector<2x128xf32>
    tpu.vector_store %arg4[%c0_20, %c0_21], %74 {strides = array<i32>} : memref<2x128xf32, #tpu.memory_space<vmem>>, vector<2x128xf32>,
    return
  }
  func.func @transform_0(%arg0: i32) -> (i32, i32) {
    %c0_i32 = arith.constant 0 : i32
    %c0_i32_0 = arith.constant 0 : i32
    return %arg0, %c0_i32 : i32, i32
  }
  func.func @transform_1(%arg0: i32) -> (i32, i32) {
    %c0_i32 = arith.constant 0 : i32
    %c0_i32_0 = arith.constant 0 : i32
    %c0_i32_1 = arith.constant 0 : i32
    return %c0_i32, %c0_i32_0 : i32, i32
  }
  func.func @transform_2(%arg0: i32) -> (i32, i32) {
    %c0_i32 = arith.constant 0 : i32
    %c0_i32_0 = arith.constant 0 : i32
    %c0_i32_1 = arith.constant 0 : i32
    return %c0_i32, %c0_i32_0 : i32, i32
  }
  func.func @transform_3(%arg0: i32) -> (i32, i32) {
    %c0_i32 = arith.constant 0 : i32
    %c0_i32_0 = arith.constant 0 : i32
    return %arg0, %c0_i32 : i32, i32
  }
}

</mosaic_0001>

<bundles_post_ra>
// kernel: squeeze.2
= control target key start
LH: loop header
LB: loop body
LE: loop exit
PB: predicated region body
PF: predicated region fallthrough
CT: control target
= control target key end

     0   :  { %s34_s8 = smov 122   ;;  %vm7_vm0 = vcmask 15360   ;;  %s35_s11 = smov 124   ;;  %s61_s0 = inlined_call_operand.vmem [shape: s32[2,8], index: 0, kind: input, shape index: {}]   ;;  %s62_s1 = inlined_call_operand.vmem [shape: s32[8,2], index: 1, kind: output, shape index: {}]  }
   0x1   :  { %v4_v0 = vld [vmem:[%s61_s0] sm:$0x3]  ;;  %s33_s0 = smov 126  }
   0x2   :  { %5 = vst [vmem:[#allocation0] sm:$0x3] %v4_v0 }
   0x9   :  { %v9_v1 = vld [vmem:[#allocation0] sm:$0x3]  }
   0xa   :  { %v21_v2 = vld [vmem:[#allocation0] sm:$0x3]   ;;  %10 = vrot.lane.b32.xlu0 %v9_v1, %s33_s0 }
   0xb   :  { %22 = vrot.lane.b32.xlu1 %v21_v2, %s34_s8  ;;  %v6_v3 = vld [vmem:[#allocation0] sm:$0x3]  }
   0xc   :  { %v15_v4 = vld [vmem:[#allocation0] sm:$0x3]   ;;  %8 = vst.msk [vmem:[%s62_s1] ss:$4 sm:$0x3] %vm7_vm0, %v6_v3  }
   0xe   :  { %16 = vrot.lane.b32.xlu0 %v15_v4, %s35_s11 }
  0x7c   :  { %v11_v5 = vpop.permute.xlu0 %10  }
  0x7d   :  { %v23_v6 = vpop.permute.xlu1 %22   ;;  %27 = vst.msk [vmem:[%s62_s1 + $0x1] ss:$4 sm:$0x3] %vm7_vm0, %v11_v5  }
  0x7e   :  { %29 = vst.msk [vmem:[%s62_s1 + $0x3] ss:$4 sm:$0x3] %vm7_vm0, %v23_v6  }
  0x80   :  { %v17_v7 = vpop.permute.xlu0 %16  }
  0x81   :  { %28 = vst.msk [vmem:[%s62_s1 + $0x2] ss:$4 sm:$0x3] %vm7_vm0, %v17_v7  }

// kernel: tile.8
= control target key start
LH: loop header
LB: loop body
LE: loop exit
PB: predicated region body
PF: predicated region fallthrough
CT: control target
= control target key end

     0   :  { %s22_s0 = inlined_call_operand.vmem [shape: f32[32], index: 0, kind: input, shape index: {}]   ;;  %s23_s1 = inlined_call_operand.vmem [shape: f32[4,32], index: 1, kind: output, shape index: {}]  }
   0x1   :  { %v4_v0 = vld [vmem:[%s22_s0] ss:$0 sm:$0xff] }
   0x2   :  { %5 = vst [vmem:[%s23_s1] sm:$0xf] %v4_v0 }

// kernel: tile.9
= control target key start
LH: loop header
LB: loop body
LE: loop exit
PB: predicated region body
PF: predicated region fallthrough
CT: control target
= control target key end

     0   :  { %vm7_vm0 = vcmask 261120   ;;  %s37_s8 = smov 32   ;;  %s38_s9 = smov 64   ;;  %vm13_vm1 = vcmask 1048320   ;;  %vm19_vm2 = vcmask 785920   ;;  %vm25_vm3 = vcmask 523520   ;;  %s55_s0 = inlined_call_operand.vmem [shape: f32[4,32], index: 0, kind: input, shape index: {}]   ;;  %s56_s1 = inlined_call_operand.vmem [shape: f32[1,128], index: 1, kind: output, shape index: {}]  }
   0x1   :  { %v4_v0 = vld [vmem:[%s55_s0] sm:$0xf]  ;;  %s36_s0 = smov 96  }
   0x2   :  { %5 = vst [vmem:[#allocation1] sm:$0xf] %v4_v0 }
   0x9   :  { %v10_v1 = vld [vmem:[#allocation1 + $0x3] sm:$0x1]   ;;  %v22_v2 = vld [vmem:[#allocation1 + $0x1] sm:$0x1]   ;;  %v6_v3 = vld [vmem:[#allocation1] sm:$0x1]  }
   0xa   :  { %11 = vrot.lane.b32.xlu0 %v10_v1, %s36_s0  ;;  %23 = vrot.lane.b32.xlu1 %v22_v2, %s37_s8  ;;  %v16_v4 = vld [vmem:[#allocation1 + $0x2] sm:$0x1]   ;;  %8 = vst.msk [vmem:[#allocation0] sm:$0x1] %vm7_vm0, %v6_v3  }
   0xe   :  { %17 = vrot.lane.b32.xlu0 %v16_v4, %s38_s9 }
  0x7c   :  { %v12_v5 = vpop.permute.xlu0 %11   ;;  %v24_v6 = vpop.permute.xlu1 %23  }
  0x7d   :  { %14 = vst.msk [vmem:[#allocation0] sm:$0x1] %vm13_vm1, %v12_v5  }
  0x80   :  { %v18_v7 = vpop.permute.xlu0 %17  }
  0x81   :  { %20 = vst.msk [vmem:[#allocation0] sm:$0x1] %vm19_vm2, %v18_v7  }
  0x82   :  { %26 = vst.msk [vmem:[#allocation0] sm:$0x1] %vm25_vm3, %v24_v6  }
  0x89   :  { %v30_v8 = vld [vmem:[#allocation0] sm:$0x1] }
  0x8a   :  { %32 = vst [vmem:[%s56_s1] sm:$0x1] %v30_v8 }

// kernel: temporal_embedding.1
= control target key start
LH: loop header
LB: loop body
LE: loop exit
PB: predicated region body
PF: predicated region fallthrough
CT: control target
= control target key end

     0   :  { %v493_v0 = vmov 4   ;;  %v494_v1 = vmov 0   ;;  %v495_v11 = vmov 1   ;;  %v496_v12 = vmov 5   ;;  %s749_s0 = inlined_call_operand.vmem [shape: s32[2,16], index: 0, kind: input, shape index: {}]   ;;  %s750_s1 = inlined_call_operand.vmem [shape: f32[512,128], index: 1, kind: input, shape index: {}]   ;;  %s751_s2 = inlined_call_operand.vmem [shape: f32[1,128], index: 2, kind: input, shape index: {}]   ;;  %s752_s3 = inlined_call_operand.vmem [shape: f32[2,128], index: 3, kind: output, shape index: {}]  }
   0x1   :  { %477 = vset.pattern.permute.xlu0 %v493_v0  ;;  %479 = vset.pattern.permute.xlu1 %v494_v1  ;;  %v533_v2 = vld [vmem:[%s749_s0] sm:$0x3]  ;;  %v118_v4 = vld [vmem:[%s750_s1 + $0x88] sm:$0xff]  ;;  %v119_v8 = vld [vmem:[%s750_s1 + $0x90] sm:$0xff]  ;;  %v497_v20 = vmov 6   ;;  %v498_v21 = vmov 2  }
   0x2   :  { %18 = vperm.xlu1 %479, %v533_v2   ;;  %39 = vperm.xlu0 %477, %v533_v2   ;;  %v117_v3 = vld [vmem:[%s750_s1 + $0x80] sm:$0xff]  ;;  %v102_v6 = vld [vmem:[%s750_s1 + $0x8] sm:$0xff]  ;;  %v120_v9 = vld [vmem:[%s750_s1 + $0x98] sm:$0xff]  ;;  %v499_v31 = vmov 7   ;;  %v500_v32 = vmov 13   ;;  %v501_v45 = vmov 12  }
   0x3   :  { %v101_v5 = vld [vmem:[%s750_s1] sm:$0xff]  ;;  %v396_v7 = vpack.c.bf16 %v118_v4, %v117_v3  ;;  %v400_v13 = vpack.c.bf16 %v120_v9, %v119_v8  ;;  %v103_v14 = vld [vmem:[%s750_s1 + $0x10] sm:$0xff]  ;;  %v104_v15 = vld [vmem:[%s750_s1 + $0x18] sm:$0xff]  ;;  %v502_v46 = vmov 9   ;;  %v503_v63 = vmov 3  }
   0x4   :  { %v398_v10 = vpack.c.bf16 %v102_v6, %v101_v5  ;;  %v121_v16 = vld [vmem:[%s750_s1 + $0xa0] sm:$0xff]  ;;  %v122_v17 = vld [vmem:[%s750_s1 + $0xa8] sm:$0xff]  ;;  %v402_v18 = vpack.c.bf16 %v104_v15, %v103_v14  ;;  %v123_v24 = vld [vmem:[%s750_s1 + $0xb0] sm:$0xff]  ;;  %v504_v0 = vmov 15  }
   0x5   :  { %397 = vmatprep.subr.bf16.mxu0 %v396_v7  ;;  %v404_v19 = vpack.c.bf16 %v122_v17, %v121_v16  ;;  %v105_v22 = vld [vmem:[%s750_s1 + $0x20] sm:$0xff]  ;;  %v106_v23 = vld [vmem:[%s750_s1 + $0x28] sm:$0xff]  ;;  %v124_v25 = vld [vmem:[%s750_s1 + $0xb8] sm:$0xff]  ;;  %v505_v17 = vmov 8  }
   0x6   :  { %480 = vset.pattern.permute.xlu1 %v495_v11  ;;  %478 = vset.pattern.permute.xlu0 %v496_v12  ;;  %v406_v26 = vpack.c.bf16 %v106_v23, %v105_v22  ;;  %v149_v27 = vld [vmem:[%s750_s1 + $0x180] sm:$0xff]  ;;  %v408_v28 = vpack.c.bf16 %v124_v25, %v123_v24  ;;  %v107_v29 = vld [vmem:[%s750_s1 + $0x30] sm:$0xff]  ;;  %v150_v30 = vld [vmem:[%s750_s1 + $0x188] sm:$0xff] }
   0x7   :  { %22 = vperm.xlu1 %480, %v533_v2   ;;  %43 = vperm.xlu0 %478, %v533_v2   ;;  %v108_v33 = vld [vmem:[%s750_s1 + $0x38] sm:$0xff]  ;;  %v428_v34 = vpack.c.bf16 %v150_v30, %v149_v27  ;;  %v133_v35 = vld [vmem:[%s750_s1 + $0x100] sm:$0xff]  ;;  %v134_v36 = vld [vmem:[%s750_s1 + $0x108] sm:$0xff]  ;;  %v506_v30 = vmov 14  }
   0x8   :  { %399 = vmatpush3.bf16.msra.mxu0 %v398_v10  ;;  %v125_v37 = vld [vmem:[%s750_s1 + $0xc0] sm:$0xff]  ;;  %v126_v38 = vld [vmem:[%s750_s1 + $0xc8] sm:$0xff]  ;;  %v430_v39 = vpack.c.bf16 %v134_v36, %v133_v35  ;;  %v410_v40 = vpack.c.bf16 %v108_v33, %v107_v29  ;;  %v151_v41 = vld [vmem:[%s750_s1 + $0x190] sm:$0xff] }
   0x9   :  { %401 = vmatprep.subr.bf16.mxu0 %v400_v13  ;;  %429 = vmatprep.subr.bf16.mxu1 %v428_v34  ;;  %v412_v42 = vpack.c.bf16 %v126_v38, %v125_v37  ;;  %v109_v43 = vld [vmem:[%s750_s1 + $0x40] sm:$0xff]  ;;  %v152_v44 = vld [vmem:[%s750_s1 + $0x198] sm:$0xff]  ;;  %v110_v47 = vld [vmem:[%s750_s1 + $0x48] sm:$0xff] }
   0xa   :  { %431 = vmatpush3.bf16.msra.mxu1 %v430_v39  ;;  %v432_v48 = vpack.c.bf16 %v152_v44, %v151_v41  ;;  %v135_v49 = vld [vmem:[%s750_s1 + $0x110] sm:$0xff]  ;;  %v136_v50 = vld [vmem:[%s750_s1 + $0x118] sm:$0xff]  ;;  %v153_v54 = vld [vmem:[%s750_s1 + $0x1a0] sm:$0xff]  ;;  %v414_v55 = vpack.c.bf16 %v110_v47, %v109_v43  ;;  %v507_v41 = vmov 10  }
   0xb   :  { %481 = vset.pattern.permute.xlu1 %v497_v20  ;;  %482 = vset.pattern.permute.xlu0 %v498_v21  ;;  %v127_v51 = vld [vmem:[%s750_s1 + $0xd0] sm:$0xff]  ;;  %v128_v52 = vld [vmem:[%s750_s1 + $0xd8] sm:$0xff]  ;;  %v434_v53 = vpack.c.bf16 %v136_v50, %v135_v49  ;;  %v154_v57 = vld [vmem:[%s750_s1 + $0x1a8] sm:$0xff] }
   0xc   :  { %48 = vperm.xlu1 %481, %v533_v2   ;;  %27 = vperm.xlu0 %482, %v533_v2   ;;  %v111_v56 = vld [vmem:[%s750_s1 + $0x50] sm:$0xff]  ;;  %v416_v58 = vpack.c.bf16 %v128_v52, %v127_v51  ;;  %v112_v59 = vld [vmem:[%s750_s1 + $0x58] sm:$0xff]  ;;  %v436_v60 = vpack.c.bf16 %v154_v57, %v153_v54  ;;  %v137_v61 = vld [vmem:[%s750_s1 + $0x120] sm:$0xff]  ;;  %v14_v52 = vlaneseq }
   0xd   :  { %403 = vmatpush3.bf16.msra.mxu0 %v402_v18  ;;  %433 = vmatprep.subr.bf16.mxu1 %v432_v48  ;;  %v138_v62 = vld [vmem:[%s750_s1 + $0x128] sm:$0xff]  ;;  %v129_v1 = vld [vmem:[%s750_s1 + $0xe0] sm:$0xff]  ;;  %v155_v5 = vld [vmem:[%s750_s1 + $0x1b0] sm:$0xff]  ;;  %v418_v7 = vpack.c.bf16 %v112_v59, %v111_v56  ;;  %v508_v48 = vmov 11  }
   0xe   :  { %405 = vmatprep.subr.bf16.mxu0 %v404_v19  ;;  %435 = vmatpush3.bf16.msra.mxu1 %v434_v53  ;;  %v130_v3 = vld [vmem:[%s750_s1 + $0xe8] sm:$0xff]  ;;  %v438_v4 = vpack.c.bf16 %v138_v62, %v137_v61  ;;  %v156_v6 = vld [vmem:[%s750_s1 + $0x1b8] sm:$0xff]  ;;  %v139_v9 = vld [vmem:[%s750_s1 + $0x130] sm:$0xff]  ;;  %v15_v54 = vand.u32 127, %v14_v52 }
   0xf   :  { %437 = vmatprep.subr.bf16.mxu1 %v436_v60  ;;  %v440_v8 = vpack.c.bf16 %v156_v6, %v155_v5  ;;  %v140_v10 = vld [vmem:[%s750_s1 + $0x138] sm:$0xff]  ;;  %v420_v11 = vpack.c.bf16 %v130_v3, %v129_v1  ;;  %v113_v12 = vld [vmem:[%s750_s1 + $0x60] sm:$0xff]  ;;  %v114_v13 = vld [vmem:[%s750_s1 + $0x68] sm:$0xff] }
  0x10   :  { %483 = vset.pattern.permute.xlu1 %v499_v31  ;;  %485 = vset.pattern.permute.xlu0 %v500_v32  ;;  %v442_v14 = vpack.c.bf16 %v140_v10, %v139_v9  ;;  %v131_v15 = vld [vmem:[%s750_s1 + $0xf0] sm:$0xff]  ;;  %v132_v16 = vld [vmem:[%s750_s1 + $0xf8] sm:$0xff]  ;;  %v157_v18 = vld [vmem:[%s750_s1 + $0x1c0] sm:$0xff]  ;;  %v422_v20 = vpack.c.bf16 %v114_v13, %v113_v12 }
  0x11   :  { %53 = vperm.xlu1 %483, %v533_v2   ;;  %85 = vperm.xlu0 %485, %v533_v2   ;;  %v158_v19 = vld [vmem:[%s750_s1 + $0x1c8] sm:$0xff]  ;;  %v141_v22 = vld [vmem:[%s750_s1 + $0x140] sm:$0xff]  ;;  %v424_v24 = vpack.c.bf16 %v132_v16, %v131_v15  ;;  %v115_v25 = vld [vmem:[%s750_s1 + $0x70] sm:$0xff] }
  0x12   :  { %407 = vmatpush3.bf16.msra.mxu0 %v406_v26  ;;  %439 = vmatpush3.bf16.msra.mxu1 %v438_v4  ;;  %v444_v21 = vpack.c.bf16 %v158_v19, %v157_v18  ;;  %v142_v23 = vld [vmem:[%s750_s1 + $0x148] sm:$0xff]  ;;  %v116_v26 = vld [vmem:[%s750_s1 + $0x78] sm:$0xff]  ;;  %v143_v33 = vld [vmem:[%s750_s1 + $0x150] sm:$0xff] }
  0x13   :  { %409 = vmatprep.subr.bf16.mxu0 %v408_v28  ;;  %441 = vmatprep.subr.bf16.mxu1 %v440_v8  ;;  %v446_v27 = vpack.c.bf16 %v142_v23, %v141_v22  ;;  %v159_v28 = vld [vmem:[%s750_s1 + $0x1d0] sm:$0xff]  ;;  %v160_v29 = vld [vmem:[%s750_s1 + $0x1d8] sm:$0xff]  ;;  %v426_v31 = vpack.c.bf16 %v116_v26, %v115_v25  ;;  %v161_v36 = vld [vmem:[%s750_s1 + $0x1e0] sm:$0xff] }
  0x14   :  { %v448_v32 = vpack.c.bf16 %v160_v29, %v159_v28  ;;  %v144_v34 = vld [vmem:[%s750_s1 + $0x158] sm:$0xff]  ;;  %v162_v37 = vld [vmem:[%s750_s1 + $0x1e8] sm:$0xff]  ;;  %v145_v39 = vld [vmem:[%s750_s1 + $0x160] sm:$0xff] }
  0x15   :  { %484 = vset.pattern.permute.xlu1 %v501_v45  ;;  %488 = vset.pattern.permute.xlu0 %v502_v46  ;;  %v450_v35 = vpack.c.bf16 %v144_v34, %v143_v33  ;;  %v452_v38 = vpack.c.bf16 %v162_v37, %v161_v36  ;;  %v163_v43 = vld [vmem:[%s750_s1 + $0x1f0] sm:$0xff]  ;;  %v164_v44 = vld [vmem:[%s750_s1 + $0x1f8] sm:$0xff]  ;;  %v321_v8 = vld [vmem:[%s751_s2] ss:$0 sm:$0xff] }
  0x16   :  { %81 = vperm.xlu1 %484, %v533_v2   ;;  %64 = vperm.xlu0 %488, %v533_v2   ;;  %v147_v45 = vld [vmem:[%s750_s1 + $0x170] sm:$0xff]  ;;  %v456_v46 = vpack.c.bf16 %v164_v44, %v163_v43  ;;  %v148_v47 = vld [vmem:[%s750_s1 + $0x178] sm:$0xff] }
  0x17   :  { %411 = vmatpush3.bf16.msra.mxu0 %v410_v40  ;;  %443 = vmatpush3.bf16.msra.mxu1 %v442_v14  ;;  %v146_v40 = vld [vmem:[%s750_s1 + $0x168] sm:$0xff]  ;;  %v458_v49 = vpack.c.bf16 %v148_v47, %v147_v45 }
  0x18   :  { %413 = vmatprep.subr.bf16.mxu0 %v412_v42  ;;  %445 = vmatprep.subr.bf16.mxu1 %v444_v21  ;;  %v454_v42 = vpack.c.bf16 %v146_v40, %v145_v39 }
  0x1a   :  { %486 = vset.pattern.permute.xlu1 %v503_v63  ;;  %491 = vset.pattern.permute.xlu0 %v504_v0 }
  0x1b   :  { %32 = vperm.xlu1 %486, %v533_v2   ;;  %95 = vperm.xlu0 %491, %v533_v2  }
  0x1c   :  { %415 = vmatpush3.bf16.msra.mxu0 %v414_v55  ;;  %447 = vmatpush3.bf16.msra.mxu1 %v446_v27 }
  0x1d   :  { %417 = vmatprep.subr.bf16.mxu0 %v416_v58  ;;  %449 = vmatprep.subr.bf16.mxu1 %v448_v32  ;;  %v509_v58 = vmov 1.0  }
  0x1f   :  { %487 = vset.pattern.permute.xlu1 %v505_v17 }
  0x20   :  { %60 = vperm.xlu1 %487, %v533_v2   ;;  %419 = vmatpush3.bf16.msra.mxu0 %v418_v7 }
  0x21   :  { %421 = vmatprep.subr.bf16.mxu0 %v420_v11  ;;  %451 = vmatpush3.bf16.msra.mxu1 %v450_v35 }
  0x22   :  { %453 = vmatprep.subr.bf16.mxu1 %v452_v38 }
  0x24   :  { %489 = vset.pattern.permute.xlu1 %v506_v30  ;;  %423 = vmatpush3.bf16.msra.mxu0 %v422_v20 }
  0x25   :  { %90 = vperm.xlu1 %489, %v533_v2   ;;  %425 = vmatprep.subr.bf16.mxu0 %v424_v24 }
  0x26   :  { %455 = vmatpush3.bf16.msra.mxu1 %v454_v42 }
  0x27   :  { %457 = vmatprep.subr.bf16.mxu1 %v456_v46 }
  0x28   :  { %427 = vmatpush3.bf16.msra.mxu0 %v426_v31 }
  0x29   :  { %490 = vset.pattern.permute.xlu1 %v507_v41 }
  0x2a   :  { %69 = vperm.xlu1 %490, %v533_v2   ;;  %459 = vmatpush3.bf16.msra.mxu1 %v458_v49 }
  0x2e   :  { %492 = vset.pattern.permute.xlu1 %v508_v48 }
  0x2f   :  { %74 = vperm.xlu1 %492, %v533_v2  }
  0x81   :  { %v19_v50 = vpop.permute.xlu1 %18  ;;  %v40_v51 = vpop.permute.xlu0 %39 }
  0x82   :  { %vm41_vm0 = vcmp.eq.s32.totalorder %v40_v51, %v15_v54  ;;  %vm20_vm9 = vcmp.eq.s32.totalorder %v19_v50, %v15_v54 }
  0x86   :  { %v23_v53 = vpop.permute.xlu1 %22  ;;  %v44_v55 = vpop.permute.xlu0 %43 }
  0x87   :  { %vm45_vm1 = vcmp.eq.s32.totalorder %v44_v55, %v15_v54  ;;  %vm24_vm7 = vcmp.eq.s32.totalorder %v23_v53, %v15_v54 }
  0x88   :  { %vm46_vm2 = vmor %vm41_vm0, %vm45_vm1 }
  0x89   :  { %vm25_vm10 = vmor %vm20_vm9, %vm24_vm7 }
  0x8b   :  { %v49_v56 = vpop.permute.xlu1 %48  ;;  %v28_v2 = vpop.permute.xlu0 %27 }
  0x8c   :  { %vm50_vm3 = vcmp.eq.s32.totalorder %v49_v56, %v15_v54  ;;  %vm29_vm8 = vcmp.eq.s32.totalorder %v28_v2, %v15_v54 }
  0x8d   :  { %vm51_vm5 = vmor %vm46_vm2, %vm50_vm3 }
  0x8e   :  { %vm30_vm11 = vmor %vm25_vm10, %vm29_vm8 }
  0x90   :  { %v54_v57 = vpop.permute.xlu1 %53  ;;  %v86_v60 = vpop.permute.xlu0 %85 }
  0x91   :  { %vm55_vm4 = vcmp.eq.s32.totalorder %v54_v57, %v15_v54  ;;  %vm87_vm15 = vcmp.eq.s32.totalorder %v86_v60, %v15_v54 }
  0x92   :  { %vm56_vm6 = vmor %vm51_vm5, %vm55_vm4 }
  0x93   :  { %322 = vmatprep.mubr.msk.f32.mxu0 %vm56_vm6, %v509_v58 }
  0x95   :  { %v82_v59 = vpop.permute.xlu1 %81  ;;  %v65_v62 = vpop.permute.xlu0 %64 }
  0x96   :  { %vm83_vm14 = vcmp.eq.s32.totalorder %v82_v59, %v15_v54  ;;  %vm66_vm6 = vcmp.eq.s32.totalorder %v65_v62, %v15_v54 }
  0x97   :  { %vm88_vm1 = vmor %vm83_vm14, %vm87_vm15 }
  0x9a   :  { %v33_v61 = vpop.permute.xlu1 %32  ;;  %v96_v0 = vpop.permute.xlu0 %95 }
  0x9b   :  { %vm34_vm12 = vcmp.eq.s32.totalorder %v33_v61, %v15_v54  ;;  %vm97_vm0 = vcmp.eq.s32.totalorder %v96_v0, %v15_v54 }
  0x9c   :  { %vm35_vm13 = vmor %vm30_vm11, %vm34_vm12 }
  0x9d   :  { %323 = vmatmul.mubr.msk.f32.vlgmr.msra.gmra.mrb[0].mxu0 %vm35_vm13, %v509_v58 }
  0x9f   :  { %v61_v63 = vpop.permute.xlu1 %60 }
  0xa0   :  { %vm62_vm5 = vcmp.eq.s32.totalorder %v61_v63, %v15_v54 }
  0xa1   :  { %vm67_vm8 = vmor %vm62_vm5, %vm66_vm6 }
  0xa4   :  { %v91_v1 = vpop.permute.xlu1 %90 }
  0xa5   :  { %vm92_vm2 = vcmp.eq.s32.totalorder %v91_v1, %v15_v54 }
  0xa6   :  { %vm93_vm3 = vmor %vm88_vm1, %vm92_vm2 }
  0xa7   :  { %vm98_vm4 = vmor %vm93_vm3, %vm97_vm0 }
  0xa8   :  { %324 = vmatprep.mubr.msk.f32.mxu1 %vm98_vm4, %v509_v58 }
  0xa9   :  { %v70_v3 = vpop.permute.xlu1 %69 }
  0xaa   :  { %vm71_vm7 = vcmp.eq.s32.totalorder %v70_v3, %v15_v54 }
  0xab   :  { %vm72_vm9 = vmor %vm67_vm8, %vm71_vm7 }
  0xae   :  { %v75_v4 = vpop.permute.xlu1 %74 }
  0xaf   :  { %vm76_vm10 = vcmp.eq.s32.totalorder %v75_v4, %v15_v54 }
  0xb0   :  { %vm77_vm11 = vmor %vm72_vm9, %vm76_vm10 }
  0xb1   :  { %325 = vmatmul.mubr.msk.f32.vlgmr.msra.gmra.mrb[0].mxu1 %vm77_vm11, %v509_v58 }
 0x170   :  { %v358_v5 = vpop.f32.mrb[0].mxu0 }
 0x171   :  { %v359_v6 = vpop.f32.mrb[1].mxu0 }
 0x172   :  { %v360_v7 = vadd.f32 %v359_v6, %v358_v5 }
 0x174   :  { %v239_v11 = vadd.f32 %v360_v7, %v321_v8 }
 0x184   :  { %v393_v9 = vpop.f32.mrb[0].mxu1 }
 0x185   :  { %v394_v10 = vpop.f32.mrb[1].mxu1 }
 0x186   :  { %v395_v12 = vadd.f32 %v394_v10, %v393_v9 }
 0x188   :  { %v309_v13 = vadd.f32 %v395_v12, %v239_v11 }
 0x18a   :  { %312 = vst [vmem:[%s752_s3] sm:$0x3] %v309_v13 }

</bundles_post_ra>
